<compile_context>
chip_gen: v5e
topology: v5e:2x2
jax: 0.10.0
libtpu: 0.0.40
codegen_flags: <defaults>
</compile_context>

<pallas_src>
import functools

import jax
import jax.numpy as jnp
from jax.experimental import pallas as pl
from jax.experimental.pallas import tpu as pltpu

LRELU_SLOPE = 0.2


def _encoder_kernel(xc_ref, w1_ref, w3_ref, wh_ref, b_ref, out_ref,
                    *, d_h, d_mid, head_pad):
    """Fused fc1 -> lrelu -> fc3 -> lrelu -> fused (means|log_vars) head."""
    xc = xc_ref[...]
    b = b_ref[...]

    # fc1 over the pre-concatenated (x, c) input.
    h = jnp.dot(xc, w1_ref[...], preferred_element_type=jnp.float32)
    h = h + b[0:1, :d_h]
    h = jnp.where(h > 0, h, LRELU_SLOPE * h)          # LeakyReLU(0.2)

    # fc3
    h = jnp.dot(h, w3_ref[...], preferred_element_type=jnp.float32)
    h = h + b[1:2, :d_mid]
    h = jnp.where(h > 0, h, LRELU_SLOPE * h)          # LeakyReLU(0.2)

    # Fused head: columns [0:latent) = means, [latent:2*latent) = log_vars,
    # remaining columns are zero padding for a lane-dense 128-wide store.
    out = jnp.dot(h, wh_ref[...], preferred_element_type=jnp.float32)
    out = out + b[2:3, :head_pad]
    out_ref[...] = out.astype(out_ref.dtype)


def encoder_forward(x, c, params, *, block_b=128):
    """Wrapper: concat inputs, pad batch, launch one batch-gridded kernel,
    then slice means / log_vars out of the lane-dense output slab."""
    latent = params["latent_size"]
    w1, w3, wh, b = params["w1"], params["w3"], params["wh"], params["b"]
    d_in, d_h = w1.shape
    d_mid = w3.shape[1]
    head_pad = wh.shape[1]

    xc = jnp.concatenate([x, c], axis=-1) if c is not None else x
    B = xc.shape[0]

    # Batch tiling: full-batch block for small B, otherwise 128-row blocks
    # (multiple of the 8-sublane granule) with zero padding to a whole grid.
    tb = min(block_b, B)
    n_blocks = -(-B // tb)
    Bp = n_blocks * tb
    if Bp != B:
        xc = jnp.pad(xc, ((0, Bp - B), (0, 0)))

    out = pl.pallas_call(
        functools.partial(_encoder_kernel, d_h=d_h, d_mid=d_mid,
                          head_pad=head_pad),
        out_shape=jax.ShapeDtypeStruct((Bp, head_pad), jnp.float32),
        grid=(n_blocks,),
        in_specs=[
            pl.BlockSpec((tb, d_in), lambda i: (i, 0)),       # activations
            pl.BlockSpec((d_in, d_h), lambda i: (0, 0)),      # W1 (resident)
            pl.BlockSpec((d_h, d_mid), lambda i: (0, 0)),     # W3 (resident)
            pl.BlockSpec((d_mid, head_pad), lambda i: (0, 0)),  # W_head
            pl.BlockSpec(b.shape, lambda i: (0, 0)),          # packed biases
        ],
        out_specs=pl.BlockSpec((tb, head_pad), lambda i: (i, 0)),
        compiler_params=pltpu.CompilerParams(
            dimension_semantics=("parallel",)),               # v7x: 2 TCs
    )(xc, w1, w3, wh, b)

    out = out[:B]
    means = out[:, :latent]
    log_vars = out[:, latent:2 * latent]
    return means, log_vars


def init_params(key, feat_size, latent_size, hidden_size):
    """Mirrors weights_init: Linear.weight ~ N(0, 0.02), Linear.bias = 0.
    Weights stored (in, out); head weights fused + zero-padded to 128 lanes;
    biases packed into one (3, maxd) buffer."""
    k1, k2, k3, k4 = jax.random.split(key, 4)
    d_in = feat_size + latent_size
    d_h = hidden_size
    d_mid = 2 * latent_size
    head_pad = max(128, -(-d_mid // 128) * 128)
    maxd = max(d_h, d_mid, head_pad)

    w1 = 0.02 * jax.random.normal(k1, (d_in, d_h), jnp.float32)
    w3 = 0.02 * jax.random.normal(k2, (d_h, d_mid), jnp.float32)
    wm = 0.02 * jax.random.normal(k3, (d_mid, latent_size), jnp.float32)
    wv = 0.02 * jax.random.normal(k4, (d_mid, latent_size), jnp.float32)

    wh = jnp.zeros((d_mid, head_pad), jnp.float32)
    wh = wh.at[:, :latent_size].set(wm)
    wh = wh.at[:, latent_size:d_mid].set(wv)

    # rows: [b1 | b3 | b_head], each zero-padded to maxd lanes (bias = 0).
    b = jnp.zeros((3, maxd), jnp.float32)

    return {"w1": w1, "w3": w3, "wh": wh, "b": b, "latent_size": latent_size}


def encoder_ref(x, c, params):
    """Pure-JAX reference for correctness checking."""
    latent = params["latent_size"]
    d_mid = 2 * latent
    d_h = params["w1"].shape[1]
    xc = jnp.concatenate([x, c], axis=-1)
    b1 = params["b"][0, :d_h]
    b3 = params["b"][1, :d_mid]
    bm = params["b"][2, :latent]
    bv = params["b"][2, latent:d_mid]
    wm = params["wh"][:, :latent]
    wv = params["wh"][:, latent:d_mid]

    h = xc @ params["w1"] + b1
    h = jnp.where(h > 0, h, LRELU_SLOPE * h)
    h = h @ params["w3"] + b3
    h = jnp.where(h > 0, h, LRELU_SLOPE * h)
    means = h @ wm + bm
    log_vars = h @ wv + bv
    return means, log_vars


if __name__ == "__main__":
    # Small synthetic config:
    #   opt.encoder_layer_sizes = [32, ..., 64], opt.latent_size = 16
    BATCH, FEAT, LATENT, HIDDEN = 8, 32, 16, 64

    key = jax.random.PRNGKey(0)
    kx, kc, kp = jax.random.split(key, 3)
    x = jax.random.normal(kx, (BATCH, FEAT), jnp.float32)
    c = jax.random.normal(kc, (BATCH, LATENT), jnp.float32)
    params = init_params(kp, FEAT, LATENT, HIDDEN)

    means, log_vars = encoder_forward(x, c, params)
    jax.block_until_ready((means, log_vars))

    means_ref, logvars_ref = encoder_ref(x, c, params)
    assert means.shape == (BATCH, LATENT) and log_vars.shape == (BATCH, LATENT)
    assert jnp.allclose(means, means_ref, atol=1e-5, rtol=1e-5)
    assert jnp.allclose(log_vars, logvars_ref, atol=1e-5, rtol=1e-5)

    print("KERNEL_OK")
</pallas_src>

<mosaic_0001>
module attributes {stable_mosaic.version = 11 : i64} {
  func.func @_encoder_kernel(%arg0: i32, %arg1: memref<8x48xf32, #tpu.memory_space<vmem>>, %arg2: memref<48x64xf32, #tpu.memory_space<vmem>>, %arg3: memref<64x32xf32, #tpu.memory_space<vmem>>, %arg4: memref<32x128xf32, #tpu.memory_space<vmem>>, %arg5: memref<3x128xf32, #tpu.memory_space<vmem>>, %arg6: memref<8x128xf32, #tpu.memory_space<vmem>>) attributes {dimension_semantics = [#tpu.dimension_semantics<parallel>], iteration_bounds = array<i64: 1>, scalar_prefetch = 0 : i64, scratch_operands = 0 : i64, tpu.core_type = #tpu.core_type<tc>, window_params = [{transform_indices = @transform_0, window_bounds = array<i64: 8, 48>}, {pipeline_mode = #tpu.pipeline_mode<synchronous>, transform_indices = @transform_1, window_bounds = array<i64: 48, 64>}, {pipeline_mode = #tpu.pipeline_mode<synchronous>, transform_indices = @transform_2, window_bounds = array<i64: 64, 32>}, {pipeline_mode = #tpu.pipeline_mode<synchronous>, transform_indices = @transform_3, window_bounds = array<i64: 32, 128>}, {pipeline_mode = #tpu.pipeline_mode<synchronous>, transform_indices = @transform_4, window_bounds = array<i64: 3, 128>}, {transform_indices = @transform_5, window_bounds = array<i64: 8, 128>}]} {
    %c0 = arith.constant 0 : index
    %c0_0 = arith.constant 0 : index
    %0 = vector.load %arg1[%c0, %c0_0] : memref<8x48xf32, #tpu.memory_space<vmem>>, vector<8x48xf32>
    %c0_1 = arith.constant 0 : index
    %c0_2 = arith.constant 0 : index
    %1 = vector.load %arg5[%c0_1, %c0_2] : memref<3x128xf32, #tpu.memory_space<vmem>>, vector<3x128xf32>
    %c0_3 = arith.constant 0 : index
    %c0_4 = arith.constant 0 : index
    %2 = vector.load %arg2[%c0_3, %c0_4] : memref<48x64xf32, #tpu.memory_space<vmem>>, vector<48x64xf32>
    %cst = arith.constant dense<0.000000e+00> : vector<8x64xf32>
    %3 = tpu.matmul %0, %2, %cst {dimension_numbers = #tpu.dot_dimension_numbers<[1], [0], [0], [1], [0, 0, 1, 1], [], []>} : vector<8x48xf32>, vector<48x64xf32>, vector<8x64xf32> -> vector<8x64xf32>
    %4 = vector.extract_strided_slice %1 {offsets = [0, 0], sizes = [1, 64], strides = [1, 1]} : vector<3x128xf32> to vector<1x64xf32>
    %5 = vector.broadcast %4 : vector<1x64xf32> to vector<8x64xf32>
    %6 = arith.addf %3, %5 : vector<8x64xf32>
    %cst_5 = arith.constant 0.000000e+00 : f32
    %7 = vector.broadcast %cst_5 : f32 to vector<8x64xf32>
    %8 = arith.cmpf ogt, %6, %7 : vector<8x64xf32>
    %cst_6 = arith.constant 2.000000e-01 : f32
    %9 = vector.broadcast %cst_6 : f32 to vector<8x64xf32>
    %10 = arith.mulf %9, %6 : vector<8x64xf32>
    %11 = arith.select %8, %6, %10 : vector<8x64xi1>, vector<8x64xf32>
    %c0_7 = arith.constant 0 : index
    %c0_8 = arith.constant 0 : index
    %12 = vector.load %arg3[%c0_7, %c0_8] : memref<64x32xf32, #tpu.memory_space<vmem>>, vector<64x32xf32>
    %cst_9 = arith.constant dense<0.000000e+00> : vector<8x32xf32>
    %13 = tpu.matmul %11, %12, %cst_9 {dimension_numbers = #tpu.dot_dimension_numbers<[1], [0], [0], [1], [0, 0, 1, 1], [], []>} : vector<8x64xf32>, vector<64x32xf32>, vector<8x32xf32> -> vector<8x32xf32>
    %14 = vector.extract_strided_slice %1 {offsets = [1, 0], sizes = [1, 32], strides = [1, 1]} : vector<3x128xf32> to vector<1x32xf32>
    %15 = vector.broadcast %14 : vector<1x32xf32> to vector<8x32xf32>
    %16 = arith.addf %13, %15 : vector<8x32xf32>
    %cst_10 = arith.constant 0.000000e+00 : f32
    %17 = vector.broadcast %cst_10 : f32 to vector<8x32xf32>
    %18 = arith.cmpf ogt, %16, %17 : vector<8x32xf32>
    %cst_11 = arith.constant 2.000000e-01 : f32
    %19 = vector.broadcast %cst_11 : f32 to vector<8x32xf32>
    %20 = arith.mulf %19, %16 : vector<8x32xf32>
    %21 = arith.select %18, %16, %20 : vector<8x32xi1>, vector<8x32xf32>
    %c0_12 = arith.constant 0 : index
    %c0_13 = arith.constant 0 : index
    %22 = vector.load %arg4[%c0_12, %c0_13] : memref<32x128xf32, #tpu.memory_space<vmem>>, vector<32x128xf32>
    %cst_14 = arith.constant dense<0.000000e+00> : vector<8x128xf32>
    %23 = tpu.matmul %21, %22, %cst_14 {dimension_numbers = #tpu.dot_dimension_numbers<[1], [0], [0], [1], [0, 0, 1, 1], [], []>} : vector<8x32xf32>, vector<32x128xf32>, vector<8x128xf32> -> vector<8x128xf32>
    %24 = vector.extract_strided_slice %1 {offsets = [2, 0], sizes = [1, 128], strides = [1, 1]} : vector<3x128xf32> to vector<1x128xf32>
    %25 = vector.broadcast %24 : vector<1x128xf32> to vector<8x128xf32>
    %26 = arith.addf %23, %25 : vector<8x128xf32>
    %c0_15 = arith.constant 0 : index
    %c0_16 = arith.constant 0 : index
    %27 = vector.load %arg6[%c0_15, %c0_16] : memref<8x128xf32, #tpu.memory_space<vmem>>, vector<8x128xf32>
    tpu.vector_store %arg6[%c0_15, %c0_16], %26 {strides = array<i32>} : memref<8x128xf32, #tpu.memory_space<vmem>>, vector<8x128xf32>,
    return
  }
  func.func @transform_0(%arg0: i32) -> (i32, i32) {
    %c0_i32 = arith.constant 0 : i32
    %c0_i32_0 = arith.constant 0 : i32
    return %arg0, %c0_i32 : i32, i32
  }
  func.func @transform_1(%arg0: i32) -> (i32, i32) {
    %c0_i32 = arith.constant 0 : i32
    %c0_i32_0 = arith.constant 0 : i32
    %c0_i32_1 = arith.constant 0 : i32
    return %c0_i32, %c0_i32_0 : i32, i32
  }
  func.func @transform_2(%arg0: i32) -> (i32, i32) {
    %c0_i32 = arith.constant 0 : i32
    %c0_i32_0 = arith.constant 0 : i32
    %c0_i32_1 = arith.constant 0 : i32
    return %c0_i32, %c0_i32_0 : i32, i32
  }
  func.func @transform_3(%arg0: i32) -> (i32, i32) {
    %c0_i32 = arith.constant 0 : i32
    %c0_i32_0 = arith.constant 0 : i32
    %c0_i32_1 = arith.constant 0 : i32
    return %c0_i32, %c0_i32_0 : i32, i32
  }
  func.func @transform_4(%arg0: i32) -> (i32, i32) {
    %c0_i32 = arith.constant 0 : i32
    %c0_i32_0 = arith.constant 0 : i32
    %c0_i32_1 = arith.constant 0 : i32
    return %c0_i32, %c0_i32_0 : i32, i32
  }
  func.func @transform_5(%arg0: i32) -> (i32, i32) {
    %c0_i32 = arith.constant 0 : i32
    %c0_i32_0 = arith.constant 0 : i32
    return %arg0, %c0_i32 : i32, i32
  }
}

</mosaic_0001>

<bundles_post_ra>
// kernel: tpu_custom_call.1
= control target key start
LH: loop header
LB: loop body
LE: loop exit
PB: predicated region body
PF: predicated region fallthrough
CT: control target
= control target key end

     0   :  { %s263_s0 = inlined_call_operand.vmem [shape: f32[8,48], index: 0, kind: input, shape index: {}]   ;;  %s264_s1 = inlined_call_operand.vmem [shape: f32[48,64], index: 1, kind: input, shape index: {}]   ;;  %s265_s2 = inlined_call_operand.vmem [shape: f32[64,32], index: 2, kind: input, shape index: {}]   ;;  %s266_s3 = inlined_call_operand.vmem [shape: f32[32,128], index: 3, kind: input, shape index: {}]   ;;  %s267_s4 = inlined_call_operand.vmem [shape: f32[3,128], index: 4, kind: input, shape index: {}]   ;;  %s268_s5 = inlined_call_operand.hbm [shape: f32[8,128], index: 5, kind: output, shape index: {}]  }
   0x1   :  { %v28_v0 = vld [vmem:[%s264_s1 + $0x28] sm:$0xff]  ;;  %v27_v1 = vld [vmem:[%s264_s1 + $0x20] sm:$0xff]  ;;  %v26_v2 = vld [vmem:[%s264_s1 + $0x18] sm:$0xff] }
   0x2   :  { %44 = vmatpush.msra.mxu0 %v28_v0  ;;  %v64_v3 = vld [vmem:[%s265_s2 + $0x38] sm:$0xff]  ;;  %v63_v4 = vld [vmem:[%s265_s2 + $0x30] sm:$0xff]  ;;  %v62_v6 = vld [vmem:[%s265_s2 + $0x28] sm:$0xff] }
   0x3   :  { %78 = vmatpush.msra.mxu1 %v64_v3  ;;  %v25_v5 = vld [vmem:[%s264_s1 + $0x10] sm:$0xff] }
   0x4   :  { %45 = vmatpush.msra.mxu0 %v27_v1 }
   0x5   :  { %10 = vsyncpa [#allocation3], 0  ;;  %79 = vmatpush.msra.mxu1 %v63_v4  ;;  %v24_v7 = vld [vmem:[%s264_s1 + $0x8] sm:$0xff]  ;;  %v61_v8 = vld [vmem:[%s265_s2 + $0x20] sm:$0xff]  ;;  %vm30_vm0 = vcmask 392192   ;;  %vm66_vm2 = vcmask 523264  }
   0x6   :  { %46 = vmatpush.msra.mxu0 %v26_v2  ;;  %v23_v9 = vld [vmem:[%s264_s1] sm:$0xff]  ;;  %v60_v10 = vld [vmem:[%s265_s2 + $0x18] sm:$0xff]  ;;  %v59_v12 = vld [vmem:[%s265_s2 + $0x10] sm:$0xff]  ;;  %vm98_vm4 = vcmask 261120   ;;  %s169_s29 = smov [#allocation2]   ;;  %s130_s8 = sshll.u32 %s268_s5, 4  ;;  %s131_s8 = int_to_ptr.hbm [resolvable:$true] %s130_s8 }
   0x7   :  { %80 = vmatpush.msra.mxu1 %v62_v6  ;;  %v21_v11 = vld [vmem:[%s263_s0] sm:$0xff]  ;;  %v58_v13 = vld [vmem:[%s265_s2 + $0x8] sm:$0xff]  ;;  %v96_v15 = vld [vmem:[%s266_s3 + $0x18] sm:$0xff]  ;;  %s128_s30 = sshll.u32 %s169_s29, 4  ;;  %s129_s30 = int_to_ptr.vmem [resolvable:$true] %s128_s30 }
   0x8   :  { %47 = vmatpush.msra.mxu0 %v25_v5  ;;  %v57_v14 = vld [vmem:[%s265_s2] sm:$0xff]  ;;  %114 = vmatpush.msra.mxu2 %v96_v15  ;;  %v95_v22 = vld [vmem:[%s266_s3 + $0x10] sm:$0xff]  ;;  %v94_v23 = vld [vmem:[%s266_s3 + $0x8] sm:$0xff] }
   0x9   :  { %81 = vmatpush.msra.mxu1 %v61_v8  ;;  %v22_v16 = vld [vmem:[%s267_s4] sm:$0x7] }
   0xa   :  { %48 = vmatpush.msra.mxu0 %v24_v7  ;;  %v29_v17 = vperm.slane %v22_v16, 0  ;;  %115 = vmatpush.msra.mxu2 %v95_v22  ;;  %v93_v24 = vld [vmem:[%s266_s3] sm:$0xff]  ;;  %v65_v25 = vperm.slane %v22_v16, 1  ;;  %v97_v30 = vperm.slane %v22_v16, 2 }
   0xb   :  { %82 = vmatpush.msra.mxu1 %v60_v10 }
   0xc   :  { %49 = vmatpush.msra.mxu0 %v23_v9  ;;  %116 = vmatpush.msra.mxu2 %v94_v23 }
   0xd   :  { %139 = vmatmul.msk.f32.vlgmr.msra.gmra.mxu0 %vm30_vm0, %v21_v11  ;;  %83 = vmatpush.msra.mxu1 %v59_v12 }
   0xe   :  { %117 = vmatpush.msra.mxu2 %v93_v24 }
   0xf   :  { %84 = vmatpush.msra.mxu1 %v58_v13 }
  0x11   :  { %85 = vmatpush.msra.mxu1 %v57_v14 }
  0x8a   :  { %v51_v18 = vpop.f32.mrf.mxu0 }
  0x8b   :  { %v52_v19 = vadd.f32 %v51_v18, %v29_v17 }
  0x8d   :  { %v55_v20 = vmul.f32 0.2, %v52_v19  ;;  %vm54_vm1 = vcmp.gt.f32.partialorder %v52_v19, 0.0 }
  0x8f   :  { %v56_v21 = vsel %vm54_vm1, %v52_v19, %v55_v20 }
  0x90   :  { %140 = vmatmul.msk.f32.vlgmr.msra.gmra.mxu1 %vm66_vm2, %v56_v21 }
 0x10d   :  { %v87_v26 = vpop.f32.mrf.mxu1 }
 0x10e   :  { %v88_v27 = vadd.f32 %v87_v26, %v65_v25 }
 0x110   :  { %v91_v28 = vmul.f32 0.2, %v88_v27  ;;  %vm90_vm3 = vcmp.gt.f32.partialorder %v88_v27, 0.0 }
 0x112   :  { %v92_v29 = vsel %vm90_vm3, %v88_v27, %v91_v28 }
 0x113   :  { %141 = vmatmul.msk.f32.vlgmr.msra.gmra.mxu2 %vm98_vm4, %v92_v29 }
 0x196   :  { %v119_v31 = vpop.f32.mrf.mxu2 }
 0x197   :  { %v120_v32 = vadd.f32 %v119_v31, %v97_v30 }
 0x199   :  { %122 = vst [vmem:[#allocation2] sm:$0xff] %v120_v32 }
 0x19a   :  { %133 = dma.vmem_to_hbm [thread:$0]  %s129_s30, 128, %s131_s8, [#allocation3]  }
 0x19b   :  { %167 = dma.done.wait [#allocation3], 128  }
 0x19c   :  { %168 = vsyncadd [#allocation3], 4294967168 }
 0x19d   :  { %138 = vsyncpa [#allocation3], 1 }

</bundles_post_ra>
